<compile_context>
chip_gen: v6e
topology: v6e:2x2x1
jax: 0.10.0
libtpu: 0.0.40
codegen_flags: <defaults>
</compile_context>

<pallas_src>
import functools

import jax
import jax.numpy as jnp
from jax import lax
from jax.experimental import pallas as pl
from jax.experimental.pallas import tpu as pltpu


def _conv3x3_s2_kernel(xa_ref, xb_ref, w_ref, b_ref, o_ref, *, th, Wo, C, O):
    """One (batch, row-tile) step of the 3x3 / stride-2 conv.

    xa_ref: (1, th, Wo+1, 4*C)  2x2 phase split of the padded input; channel
                                block p = 2*row_parity + col_parity; phase rows
                                == output rows of this tile. Covers kh in {0,1}.
    xb_ref: (1, th, Wo+1, 2*C)  row-parity-0 phases shifted down by one phase
                                row (covers the kh == 2 taps) -> halo free.
    w_ref : (9*C, O)            weights, tap-major (t = kh*3 + kw).
    b_ref : (1, O)              bias (f32).
    o_ref : (1, th, Wo, O)      output tile (NHWC).
    """
    taps = []
    # kh in {0, 1}: row parity == kh, phase row == output row.
    for kh in range(2):
        for kw in range(3):
            p = 2 * kh + (kw % 2)
            dw = kw // 2
            taps.append(xa_ref[0, :, dw:dw + Wo, p * C:(p + 1) * C])
    # kh == 2: row parity 0, phase row == output row + 1 (pre-shifted in xb).
    for kw in range(3):
        p = kw % 2
        dw = kw // 2
        taps.append(xb_ref[0, :, dw:dw + Wo, p * C:(p + 1) * C])

    patch = jnp.concatenate(taps, axis=-1)                  # (th, Wo, 9*C)
    acc = jnp.dot(                                          # single K=9*C MXU push
        patch.reshape(th * Wo, 9 * C),
        w_ref[...],
        preferred_element_type=jnp.float32,
    )
    acc = acc + b_ref[...]                                  # (1, O) broadcast, f32
    o_ref[0] = acc.reshape(th, Wo, O).astype(o_ref.dtype)


def _pick_block_h(Ho, Wo, C, O, itemsize, budget_bytes=12 * 1024 * 1024):
    """Largest divisor of Ho whose double-buffered working set fits the budget
    (keeps us under the scoped-VMEM defaults of v5e/v7x without tuning)."""
    for th in range(Ho, 0, -1):
        if Ho % th:
            continue
        per_step = th * ((Wo + 1) * 6 * C + Wo * O) * itemsize
        if 2 * per_step <= budget_bytes:
            return th
    return 1


def down_layer_conv(x_nchw, weight_oihw, bias, *, stride=2, padding=1,
                    block_h=None, compute_dtype=None):
    """Forward of DownLayer(use_conv=True): Conv2d(C, O, 3, stride=2, padding=1)."""
    assert stride == 2 and padding == 1, "DownLayer defaults"
    B, C, H, W = x_nchw.shape
    O = weight_oihw.shape[0]
    assert H % 2 == 0 and W % 2 == 0, "even spatial dims expected"
    Ho, Wo = H // 2, W // 2

    out_dtype = x_nchw.dtype
    if compute_dtype is None:
        compute_dtype = x_nchw.dtype

    # ---- layout prep (plain XLA, fused into a couple of copy passes) -------
    # NCHW -> NHWC, zero-pad by 1, 2x2 space-to-depth phase split:
    #   ph[b, r, c, i, j, :] = xpad[b, 2*i + r, 2*j + c, :]
    x = jnp.transpose(x_nchw, (0, 2, 3, 1)).astype(compute_dtype)
    xp = jnp.pad(x, ((0, 0), (1, 1), (1, 1), (0, 0)))
    ph = xp.reshape(B, Ho + 1, 2, Wo + 1, 2, C).transpose(0, 2, 4, 1, 3, 5)

    # xa: all 4 phases stacked on channels, phase rows 0..Ho-1 (kh in {0,1}).
    xa = ph.reshape(B, 4, Ho + 1, Wo + 1, C)[:, :, :Ho]
    xa = xa.transpose(0, 2, 3, 1, 4).reshape(B, Ho, Wo + 1, 4 * C)
    # xb: row-parity-0 phases, phase rows 1..Ho (kh == 2 taps), already shifted.
    xb = ph[:, 0, :, 1:Ho + 1]
    xb = xb.transpose(0, 2, 3, 1, 4).reshape(B, Ho, Wo + 1, 2 * C)

    # PyTorch weight (O, C, 3, 3) -> tap-major (9*C, O); bias (1, O) in f32.
    w = jnp.transpose(weight_oihw, (2, 3, 1, 0)).reshape(9 * C, O).astype(compute_dtype)
    b = bias.reshape(1, O).astype(jnp.float32)

    itemsize = jnp.dtype(compute_dtype).itemsize
    th = block_h if block_h is not None else _pick_block_h(Ho, Wo, C, O, itemsize)
    assert Ho % th == 0, (Ho, th)

    kernel = functools.partial(_conv3x3_s2_kernel, th=th, Wo=Wo, C=C, O=O)
    out_nhwc = pl.pallas_call(
        kernel,
        out_shape=jax.ShapeDtypeStruct((B, Ho, Wo, O), out_dtype),
        grid_spec=pltpu.PrefetchScalarGridSpec(
            num_scalar_prefetch=0,
            grid=(B, Ho // th),
            in_specs=[
                pl.BlockSpec((1, th, Wo + 1, 4 * C), lambda bi, hi: (bi, hi, 0, 0)),
                pl.BlockSpec((1, th, Wo + 1, 2 * C), lambda bi, hi: (bi, hi, 0, 0)),
                pl.BlockSpec((9 * C, O), lambda bi, hi: (0, 0)),
                pl.BlockSpec((1, O), lambda bi, hi: (0, 0)),
            ],
            out_specs=pl.BlockSpec((1, th, Wo, O), lambda bi, hi: (bi, hi, 0, 0)),
        ),
        compiler_params=pltpu.CompilerParams(
            dimension_semantics=("parallel", "parallel"),
            vmem_limit_bytes=32 * 1024 * 1024,
        ),
    )(xa, xb, w, b)

    # NHWC -> NCHW to match the PyTorch module's output layout.
    return jnp.transpose(out_nhwc, (0, 3, 1, 2))


if __name__ == "__main__":
    key = jax.random.PRNGKey(0)
    k_x, k_w, k_b = jax.random.split(key, 3)

    # Small shapes consistent with the module: batch=2, channels=4, spatial=16.
    B, C, H, W = 2, 4, 16, 16
    O = C  # out_channels defaults to in_channels

    x = jax.random.normal(k_x, (B, C, H, W), dtype=jnp.float32)
    weight = jax.random.normal(k_w, (O, C, 3, 3), dtype=jnp.float32) * 0.1
    bias = jax.random.normal(k_b, (O,), dtype=jnp.float32) * 0.1

    # Reference (same semantics as the PyTorch module).
    ref = lax.conv_general_dilated(
        x, weight,
        window_strides=(2, 2),
        padding=[(1, 1), (1, 1)],
        dimension_numbers=("NCHW", "OIHW", "NCHW"),
    ) + bias.reshape(1, O, 1, 1)

    # f32 path; block_h=4 exercises the spatial tile axis (grid = (2, 2)).
    down_f32 = jax.jit(functools.partial(down_layer_conv, block_h=4))
    out = jax.block_until_ready(down_f32(x, weight, bias))
    assert out.shape == (B, O, H // 2, W // 2), out.shape
    assert jnp.allclose(out, ref, rtol=1e-3, atol=1e-3), float(
        jnp.max(jnp.abs(out - ref)))

    # bf16 compute path (f32 MXU accumulation), default (whole-image) row tile.
    down_bf16 = jax.jit(functools.partial(down_layer_conv,
                                          compute_dtype=jnp.bfloat16))
    out_bf16 = jax.block_until_ready(down_bf16(x, weight, bias))
    assert out_bf16.shape == (B, O, H // 2, W // 2), out_bf16.shape
    assert jnp.allclose(out_bf16, ref, rtol=1e-1, atol=1e-1), float(
        jnp.max(jnp.abs(out_bf16 - ref)))

    print("KERNEL_OK")
</pallas_src>

<mosaic_0001>
module attributes {stable_mosaic.version = 11 : i64} {
  func.func @_conv3x3_s2_kernel(%arg0: i32, %arg1: i32, %arg2: memref<1x4x9x16xf32, #tpu.memory_space<vmem>>, %arg3: memref<1x4x9x8xf32, #tpu.memory_space<vmem>>, %arg4: memref<36x4xf32, #tpu.memory_space<vmem>>, %arg5: memref<1x4xf32, #tpu.memory_space<vmem>>, %arg6: memref<1x4x8x4xf32, #tpu.memory_space<vmem>>) attributes {dimension_semantics = [#tpu.dimension_semantics<parallel>, #tpu.dimension_semantics<parallel>], iteration_bounds = array<i64: 2, 2>, scalar_prefetch = 0 : i64, scratch_operands = 0 : i64, tpu.core_type = #tpu.core_type<tc>, window_params = [{transform_indices = @transform_0, window_bounds = array<i64: 1, 4, 9, 16>}, {transform_indices = @transform_1, window_bounds = array<i64: 1, 4, 9, 8>}, {pipeline_mode = #tpu.pipeline_mode<synchronous>, transform_indices = @transform_2, window_bounds = array<i64: 36, 4>}, {pipeline_mode = #tpu.pipeline_mode<synchronous>, transform_indices = @transform_3, window_bounds = array<i64: 1, 4>}, {transform_indices = @transform_4, window_bounds = array<i64: 1, 4, 8, 4>}]} {
    %c0 = arith.constant 0 : index
    %c0_0 = arith.constant 0 : index
    %c0_1 = arith.constant 0 : index
    %c0_2 = arith.constant 0 : index
    %0 = vector.load %arg2[%c0, %c0_0, %c0_1, %c0_2] : memref<1x4x9x16xf32, #tpu.memory_space<vmem>>, vector<1x4x8x4xf32>
    %1 = vector.shape_cast %0 : vector<1x4x8x4xf32> to vector<4x8x4xf32>
    %c0_3 = arith.constant 0 : index
    %c0_4 = arith.constant 0 : index
    %c0_5 = arith.constant 0 : index
    %c4 = arith.constant 4 : index
    %2 = vector.load %arg2[%c0_3, %c0_4, %c0_5, %c4] : memref<1x4x9x16xf32, #tpu.memory_space<vmem>>, vector<1x4x8x4xf32>
    %3 = vector.shape_cast %2 : vector<1x4x8x4xf32> to vector<4x8x4xf32>
    %c0_6 = arith.constant 0 : index
    %c0_7 = arith.constant 0 : index
    %c1 = arith.constant 1 : index
    %c0_8 = arith.constant 0 : index
    %4 = vector.load %arg2[%c0_6, %c0_7, %c1, %c0_8] : memref<1x4x9x16xf32, #tpu.memory_space<vmem>>, vector<1x4x8x4xf32>
    %5 = vector.shape_cast %4 : vector<1x4x8x4xf32> to vector<4x8x4xf32>
    %c0_9 = arith.constant 0 : index
    %c0_10 = arith.constant 0 : index
    %c0_11 = arith.constant 0 : index
    %c8 = arith.constant 8 : index
    %6 = vector.load %arg2[%c0_9, %c0_10, %c0_11, %c8] : memref<1x4x9x16xf32, #tpu.memory_space<vmem>>, vector<1x4x8x4xf32>
    %7 = vector.shape_cast %6 : vector<1x4x8x4xf32> to vector<4x8x4xf32>
    %c0_12 = arith.constant 0 : index
    %c0_13 = arith.constant 0 : index
    %c0_14 = arith.constant 0 : index
    %c12 = arith.constant 12 : index
    %8 = vector.load %arg2[%c0_12, %c0_13, %c0_14, %c12] : memref<1x4x9x16xf32, #tpu.memory_space<vmem>>, vector<1x4x8x4xf32>
    %9 = vector.shape_cast %8 : vector<1x4x8x4xf32> to vector<4x8x4xf32>
    %c0_15 = arith.constant 0 : index
    %c0_16 = arith.constant 0 : index
    %c1_17 = arith.constant 1 : index
    %c8_18 = arith.constant 8 : index
    %10 = vector.load %arg2[%c0_15, %c0_16, %c1_17, %c8_18] : memref<1x4x9x16xf32, #tpu.memory_space<vmem>>, vector<1x4x8x4xf32>
    %11 = vector.shape_cast %10 : vector<1x4x8x4xf32> to vector<4x8x4xf32>
    %c0_19 = arith.constant 0 : index
    %c0_20 = arith.constant 0 : index
    %c0_21 = arith.constant 0 : index
    %c0_22 = arith.constant 0 : index
    %12 = vector.load %arg3[%c0_19, %c0_20, %c0_21, %c0_22] : memref<1x4x9x8xf32, #tpu.memory_space<vmem>>, vector<1x4x8x4xf32>
    %13 = vector.shape_cast %12 : vector<1x4x8x4xf32> to vector<4x8x4xf32>
    %c0_23 = arith.constant 0 : index
    %c0_24 = arith.constant 0 : index
    %c0_25 = arith.constant 0 : index
    %c4_26 = arith.constant 4 : index
    %14 = vector.load %arg3[%c0_23, %c0_24, %c0_25, %c4_26] : memref<1x4x9x8xf32, #tpu.memory_space<vmem>>, vector<1x4x8x4xf32>
    %15 = vector.shape_cast %14 : vector<1x4x8x4xf32> to vector<4x8x4xf32>
    %c0_27 = arith.constant 0 : index
    %c0_28 = arith.constant 0 : index
    %c1_29 = arith.constant 1 : index
    %c0_30 = arith.constant 0 : index
    %16 = vector.load %arg3[%c0_27, %c0_28, %c1_29, %c0_30] : memref<1x4x9x8xf32, #tpu.memory_space<vmem>>, vector<1x4x8x4xf32>
    %17 = vector.shape_cast %16 : vector<1x4x8x4xf32> to vector<4x8x4xf32>
    %18 = tpu.concatenate %1, %3, %5, %7, %9, %11, %13, %15, %17 in 2 : vector<4x8x4xf32>, vector<4x8x4xf32>, vector<4x8x4xf32>, vector<4x8x4xf32>, vector<4x8x4xf32>, vector<4x8x4xf32>, vector<4x8x4xf32>, vector<4x8x4xf32>, vector<4x8x4xf32> -> vector<4x8x36xf32>
    %19 = vector.shape_cast %18 : vector<4x8x36xf32> to vector<32x36xf32>
    %c0_31 = arith.constant 0 : index
    %c0_32 = arith.constant 0 : index
    %20 = vector.load %arg4[%c0_31, %c0_32] : memref<36x4xf32, #tpu.memory_space<vmem>>, vector<36x4xf32>
    %cst = arith.constant dense<0.000000e+00> : vector<32x4xf32>
    %21 = tpu.matmul %19, %20, %cst {dimension_numbers = #tpu.dot_dimension_numbers<[1], [0], [0], [1], [0, 0, 1, 1], [], []>} : vector<32x36xf32>, vector<36x4xf32>, vector<32x4xf32> -> vector<32x4xf32>
    %c0_33 = arith.constant 0 : index
    %c0_34 = arith.constant 0 : index
    %22 = vector.load %arg5[%c0_33, %c0_34] : memref<1x4xf32, #tpu.memory_space<vmem>>, vector<1x4xf32>
    %23 = vector.broadcast %22 : vector<1x4xf32> to vector<32x4xf32>
    %24 = arith.addf %21, %23 : vector<32x4xf32>
    %25 = vector.shape_cast %24 : vector<32x4xf32> to vector<4x8x4xf32>
    %c0_35 = arith.constant 0 : index
    %c0_36 = arith.constant 0 : index
    %c0_37 = arith.constant 0 : index
    %c0_38 = arith.constant 0 : index
    %26 = vector.load %arg6[%c0_35, %c0_36, %c0_37, %c0_38] : memref<1x4x8x4xf32, #tpu.memory_space<vmem>>, vector<1x4x8x4xf32>
    %27 = vector.shape_cast %26 : vector<1x4x8x4xf32> to vector<4x8x4xf32>
    %28 = vector.shape_cast %25 : vector<4x8x4xf32> to vector<1x4x8x4xf32>
    tpu.vector_store %arg6[%c0_35, %c0_36, %c0_37, %c0_38], %28 {strides = array<i32>} : memref<1x4x8x4xf32, #tpu.memory_space<vmem>>, vector<1x4x8x4xf32>,
    return
  }
  func.func @transform_0(%arg0: i32, %arg1: i32) -> (i32, i32, i32, i32) {
    %c0_i32 = arith.constant 0 : i32
    %c0_i32_0 = arith.constant 0 : i32
    %c0_i32_1 = arith.constant 0 : i32
    return %arg0, %arg1, %c0_i32, %c0_i32_0 : i32, i32, i32, i32
  }
  func.func @transform_1(%arg0: i32, %arg1: i32) -> (i32, i32, i32, i32) {
    %c0_i32 = arith.constant 0 : i32
    %c0_i32_0 = arith.constant 0 : i32
    %c0_i32_1 = arith.constant 0 : i32
    return %arg0, %arg1, %c0_i32, %c0_i32_0 : i32, i32, i32, i32
  }
  func.func @transform_2(%arg0: i32, %arg1: i32) -> (i32, i32) {
    %c0_i32 = arith.constant 0 : i32
    %c0_i32_0 = arith.constant 0 : i32
    %c0_i32_1 = arith.constant 0 : i32
    return %c0_i32, %c0_i32_0 : i32, i32
  }
  func.func @transform_3(%arg0: i32, %arg1: i32) -> (i32, i32) {
    %c0_i32 = arith.constant 0 : i32
    %c0_i32_0 = arith.constant 0 : i32
    %c0_i32_1 = arith.constant 0 : i32
    return %c0_i32, %c0_i32_0 : i32, i32
  }
  func.func @transform_4(%arg0: i32, %arg1: i32) -> (i32, i32, i32, i32) {
    %c0_i32 = arith.constant 0 : i32
    %c0_i32_0 = arith.constant 0 : i32
    %c0_i32_1 = arith.constant 0 : i32
    return %arg0, %arg1, %c0_i32, %c0_i32_0 : i32, i32, i32, i32
  }
}

</mosaic_0001>

<bundles_post_ra>
// kernel: down_layer_conv.1
= control target key start
LH: loop header
LB: loop body
LE: loop exit
PB: predicated region body
PF: predicated region fallthrough
CT: control target
= control target key end

     0   :  { %s813_s15 = smov 0   ;;  %s815_s16 = smov 0   ;;  %s953_s0 = inlined_call_operand.vmem [shape: f32[2,8,9,16], index: 0, kind: input, shape index: {}]   ;;  %s954_s1 = inlined_call_operand.vmem [shape: f32[2,8,9,8], index: 1, kind: input, shape index: {}]   ;;  %s955_s2 = inlined_call_operand.vmem [shape: f32[36,4], index: 2, kind: input, shape index: {}]   ;;  %s956_s3 = inlined_call_operand.vmem [shape: f32[1,4], index: 3, kind: input, shape index: {}]   ;;  %s957_s4 = inlined_call_operand.vmem [shape: f32[2,8,8,4], index: 4, kind: output, shape index: {}]  }
   0x1   :  { %s817_s17 = smov 0   ;;  %s819_s18 = smov 0  }
   0x2   :  { %s821_s19 = smov 0  }
   0x3 LB: > { %s23_s20 = sadd.s32 1, %s773_s17  ;;  %s26_s21 = sadd.s32 1, %s777_s18  ;;  %s781_s19 = sphi %s821_s19, %s14_s19   ;;  %s777_s18 = sphi %s819_s18, %s961_s18   ;;  %s773_s17 = sphi %s817_s17, %s960_s17   ;;  %s769_s16 = sphi %s815_s16, %s959_s16   ;;  %s765_s15 = sphi %s813_s15, %s958_s15  }
   0x4   : > { %p24_p0 = scmp.ge.s32.totalorder %s23_s20, 2  ;;  %p643_p1 = scmp.ge.s32.totalorder %s781_s19, 1 }
   0x5   : > { %p202_p2 = scmp.lt.s32.totalorder %s781_s19, 5 }
   0x6   : > { %s963_s20 = smov (%p24_p0, %s23_s20), 0  ;;  %s965_s21 = smov (!%p24_p0, %s26_s21), %s777_s18 }
   0x7   : > { %p203_p3 = pnand %p643_p1, %p202_p2  ;;  %p28_p4 = scmp.ge.s32.totalorder %s965_s21, 2 }
   0x8   : > { %s644_s22 = sshll.u32 (!%p203_p3), %s765_s15, 2  ;;  %p248_p5 = scmp.lt.s32.totalorder (!%p203_p3), %s769_s16, 1 }
   0x9   : > { %s967_s21 = smov (%p28_p4, %s965_s21), 0  ;;  %206 = sbr.rel (%p203_p3) target bundleno = 370 (0x172), region = 36 }
   0xa   : > { %p250_p6 = scmp.lt.s32.totalorder (!%p203_p3), %s644_s22, 7  ;;  %s783_s30 = smov (!%p203_p3), 8  }
   0xb   : > { %s784_s5 = smov (!%p203_p3), 4   ;;  %s785_s10 = smov (!%p203_p3), 12  }
   0xc   : > { %s786_s27 = smov (!%p203_p3), 24  }
   0xe   : > { %s969_s16 = smov (!%p248_p5, %s769_s16), 1  ;;  %s971_s22 = smov (!%p250_p6, %s644_s22), 7  ;;  %v411_v8 = vld [vmem:[%s955_s2 + $0x20] sm:$0xf]  ;;  %vm432_vm0 = vcmask 1043456   ;;  %v410_v9 = vld [vmem:[%s955_s2 + $0x18] sm:$0xff] }
   0xf   : > { %s646_s23 = sshll.u32 %s969_s16, 4  ;;  %s645_s24 = sshll.u32 %s971_s22, 1  ;;  %672 = vmatprep.subr.msk.mxu0 %vm432_vm0, %v411_v8  ;;  %688 = vmatprep.subr.msk.mxu1 %vm432_vm0, %v411_v8  ;;  %v409_v10 = vld [vmem:[%s955_s2 + $0x10] sm:$0xff]  ;;  %v408_v11 = vld [vmem:[%s955_s2 + $0x8] sm:$0xff]  ;;  %v407_v14 = vld [vmem:[%s955_s2] sm:$0xff]  ;;  %vm372_vm1 = vcmask 64512  }
  0x10   : > { %s849_s25 = sadd.s32 %s646_s23, %s645_s24  ;;  %673 = vmatpush3.msk.msra.mxu0 %vm432_vm0, %v411_v8  ;;  %693 = vmatpush3.msk.msra.mxu1 %vm432_vm0, %v411_v8  ;;  %s653_s28 = sshll.u32 %s969_s16, 3  ;;  %vm377_vm2 = vcmask 97280   ;;  %vm382_vm3 = vcmask 130048   ;;  %vm387_vm4 = vcmask 162816   ;;  %vm392_vm5 = vcmask 195584  }
  0x11   : > { %s647_s26 = sshll.u32 %s849_s25, 3  ;;  %674 = vmatprep.subr.mxu0 %v410_v9  ;;  %689 = vmatprep.subr.mxu1 %v410_v9  ;;  %vm397_vm6 = vcmask 228352   ;;  %vm402_vm7 = vcmask 261120   ;;  %vm419_vm8 = vcmask 293888   ;;  %vm371_vm9 = vcmask 31744  }
  0x12   : > { %s256_s29 = scalar_lea.vmem %s953_s0, %s647_s26  ;;  %s883_s15 = scalar_lea.vmem %s954_s1, %s647_s26  ;;  %675 = vmatpush3.msra.mxu0 %v410_v9  ;;  %694 = vmatpush3.msra.mxu1 %v410_v9 }
  0x13   : > { %v284_v0 = vld [vmem:[%s256_s29 + $0x11] sm:$0xff]  ;;  %v283_v1 = vld [vmem:[%s256_s29 + $0x1] sm:$0xff]  ;;  %676 = vmatprep.subr.mxu0 %v409_v10  ;;  %690 = vmatprep.subr.mxu1 %v409_v10 }
  0x14   : > { %301 = vrot.lane.b32.xlu1 %v284_v0, %s783_s30  ;;  %299 = vrot.lane.b32.xlu0 %v283_v1, %s783_s30  ;;  %v286_v2 = vld [vmem:[%s256_s29 + $0x31] sm:$0xff]  ;;  %v285_v3 = vld [vmem:[%s256_s29 + $0x21] sm:$0xff] }
  0x15   : > { %v857_v4 = vld [vmem:[%s256_s29 + $0x20] sm:$0xff]  ;;  %v863_v6 = vld [vmem:[%s256_s29 + $0x30] sm:$0xff]  ;;  %677 = vmatpush3.msra.mxu0 %v409_v10  ;;  %695 = vmatpush3.msra.mxu1 %v409_v10 }
  0x16   : > { %v859_v5 = vld [vmem:[%s256_s29] sm:$0xff]  ;;  %v865_v7 = vld [vmem:[%s256_s29 + $0x10] sm:$0xff]  ;;  %678 = vmatprep.subr.mxu0 %v408_v11  ;;  %691 = vmatprep.subr.mxu1 %v408_v11  ;;  %s897_s29 = sadd.s32 %s653_s28, %s971_s22 }
  0x17   : > { %v289_v12 = vld [vmem:[%s883_s15 + $0x20] sm:$0xff]  ;;  %679 = vmatpush3.msra.mxu0 %v408_v11  ;;  %696 = vmatpush3.msra.mxu1 %v408_v11  ;;  %v290_v15 = vld [vmem:[%s883_s15 + $0x30] sm:$0xff]  ;;  %s654_s16 = sshll.u32 %s897_s29, 3 }
  0x18   : > { %305 = vrot.lane.b32.xlu1 %v286_v2, %s783_s30  ;;  %303 = vrot.lane.b32.xlu0 %v285_v3, %s783_s30  ;;  %v287_v13 = vld [vmem:[%s883_s15] sm:$0xff]  ;;  %v288_v16 = vld [vmem:[%s883_s15 + $0x10] sm:$0xff]  ;;  %s787_s30 = smov 32   ;;  %s277_s8 = scalar_lea.vmem %s957_s4, %s654_s16 }
  0x19   : > { %680 = vmatprep.subr.mxu0 %v407_v14  ;;  %692 = vmatprep.subr.mxu1 %v407_v14  ;;  %v293_v17 = vld [vmem:[%s883_s15 + $0x21] sm:$0xff]  ;;  %v294_v19 = vld [vmem:[%s883_s15 + $0x31] sm:$0xff] }
  0x1a   : > { %681 = vmatpush3.msra.mxu0 %v407_v14  ;;  %697 = vmatpush3.msra.mxu1 %v407_v14  ;;  %v291_v18 = vld [vmem:[%s883_s15 + $0x1] sm:$0xff]  ;;  %v292_v20 = vld [vmem:[%s883_s15 + $0x11] sm:$0xff] }
  0x1c   : > { %319 = vrot.lane.b32.xlu1 %v857_v4, %s784_s5  ;;  %315 = vrot.lane.b32.xlu0 %v859_v5, %s784_s5 }
  0x20   : > { %321 = vrot.lane.b32.xlu1 %v863_v6, %s784_s5  ;;  %317 = vrot.lane.b32.xlu0 %v865_v7, %s784_s5 }
  0x24   : > { %331 = vrot.lane.b32.xlu1 %v285_v3, %s785_s10  ;;  %327 = vrot.lane.b32.xlu0 %v283_v1, %s785_s10 }
  0x28   : > { %333 = vrot.lane.b32.xlu1 %v286_v2, %s785_s10  ;;  %329 = vrot.lane.b32.xlu0 %v284_v0, %s785_s10 }
  0x2c   : > { %347 = vrot.lane.b32.xlu1 %v289_v12, %s786_s27  ;;  %343 = vrot.lane.b32.xlu0 %v287_v13, %s786_s27 }
  0x30   : > { %349 = vrot.lane.b32.xlu1 %v290_v15, %s786_s27  ;;  %345 = vrot.lane.b32.xlu0 %v288_v16, %s786_s27 }
  0x34   : > { %363 = vrot.lane.b32.xlu1 %v293_v17, %s787_s30  ;;  %359 = vrot.lane.b32.xlu0 %v291_v18, %s787_s30 }
  0x38   : > { %365 = vrot.lane.b32.xlu1 %v294_v19, %s787_s30  ;;  %361 = vrot.lane.b32.xlu0 %v292_v20, %s787_s30 }
  0x86   : > { %v302_v21 = vpop.permute.xlu1 %301  ;;  %v300_v22 = vpop.permute.xlu0 %299 }
  0x87   : > { %v373_v33 = vsel %vm372_vm1, %v859_v5, %v300_v22  ;;  %v374_v39 = vsel %vm372_vm1, %v865_v7, %v302_v21  ;;  %v655_v5 = vld [vmem:[%s956_s3] ss:$0 sm:$0xff] }
  0x8a   : > { %v306_v23 = vpop.permute.xlu1 %305  ;;  %v304_v24 = vpop.permute.xlu0 %303 }
  0x8b   : > { %v375_v34 = vsel %vm372_vm1, %v857_v4, %v304_v24  ;;  %v376_v40 = vsel %vm372_vm1, %v863_v6, %v306_v23 }
  0x8e   : > { %v320_v25 = vpop.permute.xlu1 %319  ;;  %v316_v26 = vpop.permute.xlu0 %315 }
  0x8f   : > { %v380_v35 = vsel %vm377_vm2, %v375_v34, %v320_v25  ;;  %v378_v36 = vsel %vm377_vm2, %v373_v33, %v316_v26 }
  0x90   : > { %v385_v41 = vsel %vm382_vm3, %v380_v35, %v320_v25  ;;  %v383_v42 = vsel %vm382_vm3, %v378_v36, %v316_v26 }
  0x92   : > { %v322_v27 = vpop.permute.xlu1 %321  ;;  %v318_v28 = vpop.permute.xlu0 %317 }
  0x93   : > { %v381_v43 = vsel %vm377_vm2, %v376_v40, %v322_v27  ;;  %v379_v44 = vsel %vm377_vm2, %v374_v39, %v318_v28 }
  0x94   : > { %v386_v51 = vsel %vm382_vm3, %v381_v43, %v322_v27  ;;  %v384_v52 = vsel %vm382_vm3, %v379_v44, %v318_v28 }
  0x96   : > { %v332_v29 = vpop.permute.xlu1 %331  ;;  %v328_v30 = vpop.permute.xlu0 %327 }
  0x97   : > { %v390_v45 = vsel %vm387_vm4, %v385_v41, %v332_v29  ;;  %v388_v46 = vsel %vm387_vm4, %v383_v42, %v328_v30 }
  0x9a   : > { %v334_v31 = vpop.permute.xlu1 %333  ;;  %v330_v32 = vpop.permute.xlu0 %329 }
  0x9b   : > { %v391_v53 = vsel %vm387_vm4, %v386_v51, %v334_v31  ;;  %v389_v54 = vsel %vm387_vm4, %v384_v52, %v330_v32 }
  0x9e   : > { %v348_v37 = vpop.permute.xlu1 %347  ;;  %v344_v38 = vpop.permute.xlu0 %343 }
  0x9f   : > { %v395_v49 = vsel %vm392_vm5, %v390_v45, %v348_v37  ;;  %v393_v50 = vsel %vm392_vm5, %v388_v46, %v344_v38 }
  0xa0   : > { %v400_v55 = vsel %vm397_vm6, %v395_v49, %v348_v37  ;;  %v398_v56 = vsel %vm397_vm6, %v393_v50, %v344_v38 }
  0xa2   : > { %v350_v47 = vpop.permute.xlu1 %349  ;;  %v346_v48 = vpop.permute.xlu0 %345 }
  0xa3   : > { %v396_v59 = vsel %vm392_vm5, %v391_v53, %v350_v47  ;;  %v394_v60 = vsel %vm392_vm5, %v389_v54, %v346_v48 }
  0xa4   : > { %v401_v63 = vsel %vm397_vm6, %v396_v59, %v350_v47  ;;  %v399_v0 = vsel %vm397_vm6, %v394_v60, %v346_v48 }
  0xa6   : > { %v364_v57 = vpop.permute.xlu1 %363  ;;  %v360_v58 = vpop.permute.xlu0 %359 }
  0xa7   : > { %v403_v61 = vsel %vm402_vm7, %v398_v56, %v360_v58  ;;  %v405_v62 = vsel %vm402_vm7, %v400_v55, %v364_v57 }
  0xa8   : > { %682 = vmatprep.mubr.msk.f32.mxu0 %vm419_vm8, %v403_v61  ;;  %685 = vmatprep.mubr.msk.f32.mxu1 %vm419_vm8, %v405_v62 }
  0xaa   : > { %v366_v1 = vpop.permute.xlu1 %365  ;;  %v362_v2 = vpop.permute.xlu0 %361 }
  0xab   : > { %v406_v3 = vsel %vm402_vm7, %v401_v63, %v366_v1  ;;  %v404_v4 = vsel %vm402_vm7, %v399_v0, %v362_v2 }
  0xac   : > { %683 = vmatmul.mubr.msk.f32.vlgmr.msra.gmra.mxu0 %vm419_vm8, %v404_v4  ;;  %686 = vmatmul.mubr.msk.f32.vlgmr.msra.gmra.mxu1 %vm419_vm8, %v406_v3 }
 0x16c   : > { %v684_v6 = vpop.f32.mrf.mxu0  ;;  %v687_v7 = vpop.f32.mrf.mxu1 }
 0x16d   : > { %v508_v8 = vadd.f32 %v684_v6, %v655_v5  ;;  %v518_v9 = vadd.f32 %v687_v7, %v655_v5 }
 0x16e   : > { %v502_v10 = vpop.f32.mrf.mxu0  ;;  %v512_v11 = vpop.f32.mrf.mxu1 }
 0x16f   : > { %522 = vst.msk [vmem:[%s277_s8 + $0x8] sm:$0xff] %vm371_vm9, %v508_v8  ;;  %524 = vst.msk [vmem:[%s277_s8 + $0x18] sm:$0xff] %vm371_vm9, %v518_v9  ;;  %v503_v12 = vadd.f32 %v655_v5, %v502_v10  ;;  %v513_v13 = vadd.f32 %v655_v5, %v512_v11 }
 0x171   : > { %521 = vst.msk [vmem:[%s277_s8] sm:$0xff] %vm371_vm9, %v503_v12  ;;  %523 = vst.msk [vmem:[%s277_s8 + $0x10] sm:$0xff] %vm371_vm9, %v513_v13 }
 0x172 PF: > { %s14_s19 = sadd.s32 1, %s781_s19   ;;  %s958_s15 = smov %s773_s17 }
 0x173   : > { %p11_p7 = scmp.ge.s32.totalorder %s14_s19, 6   ;;  %s959_s16 = smov %s777_s18 }
 0x174   : > { %s960_s17 = smov %s963_s20  ;;  %s961_s18 = smov %s967_s21 }
 0x175   :  { %13 = sbr.rel (!%p11_p7) target bundleno = 3 (0x3), region = 69 }

</bundles_post_ra>
